<compile_context>
chip_gen: v5e
topology: v5e:2x2
jax: 0.10.0
libtpu: 0.0.40
codegen_flags: <defaults>
</compile_context>

<pallas_src>
import functools

import jax
import jax.numpy as jnp
from jax.experimental import pallas as pl
from jax.experimental.pallas import tpu as pltpu


def _round_up(x, m):
    return ((x + m - 1) // m) * m


def _critic_kernel(x_ref, p_ref, o_ref, *, m):
    """One batch tile: 3 MXU matmuls + VPU bias/ReLU, params resident in VMEM."""
    cdt = p_ref.dtype
    S, H0p, H1p, Ap = m["S"], m["H0p"], m["H1p"], m["Ap"]

    x = x_ref[...].astype(cdt)

    # Layer 1
    w1 = p_ref[m["r_w1"]:m["r_w1"] + S, 0:H0p]
    b1 = p_ref[m["r_b1"]:m["r_b1"] + 1, 0:H0p]
    h1 = jnp.dot(x, w1, preferred_element_type=jnp.float32) + b1
    h1 = jnp.maximum(h1, 0.0).astype(cdt)

    # Layer 2
    w2 = p_ref[m["r_w2"]:m["r_w2"] + H0p, 0:H1p]
    b2 = p_ref[m["r_b2"]:m["r_b2"] + 1, 0:H1p]
    h2 = jnp.dot(h1, w2, preferred_element_type=jnp.float32) + b2
    h2 = jnp.maximum(h2, 0.0).astype(cdt)

    # Layer 3 (output, lane-dense padded width Ap)
    w3 = p_ref[m["r_w3"]:m["r_w3"] + H1p, 0:Ap]
    b3 = p_ref[m["r_b3"]:m["r_b3"] + 1, 0:Ap]
    out = jnp.dot(h2, w3, preferred_element_type=jnp.float32) + b3
    o_ref[...] = out.astype(o_ref.dtype)


def pack_params(params, dtype=jnp.float32):
    """Pack w1,b1,w2,b2,w3,b3 into one zero-padded (R, C) slab + slice metadata.

    Weights are stored (in_features, out_features) so the kernel computes
    x @ W + b (identical to torch's x @ W.T + b with W=(out, in)).
    Padded rows/columns are zero, so they contribute nothing downstream.
    """
    w1 = jnp.asarray(params["w1"])
    w2 = jnp.asarray(params["w2"])
    w3 = jnp.asarray(params["w3"])
    b1 = jnp.asarray(params["b1"]).reshape(-1)
    b2 = jnp.asarray(params["b2"]).reshape(-1)
    b3 = jnp.asarray(params["b3"]).reshape(-1)

    S, H0 = w1.shape
    H0_, H1 = w2.shape
    H1_, A = w3.shape
    assert H0_ == H0 and H1_ == H1

    # Lane-dense padded widths (multiples of 128).
    H0p = _round_up(H0, 128)
    H1p = _round_up(H1, 128)
    Ap = _round_up(A, 128)
    C = max(H0p, H1p, Ap)

    # Row layout: every section starts on a sublane-aligned (multiple-of-8) row.
    Sr = _round_up(S, 8)
    r_w1 = 0
    r_b1 = Sr
    r_w2 = r_b1 + 8
    r_b2 = r_w2 + H0p
    r_w3 = r_b2 + 8
    r_b3 = r_w3 + H1p
    R = r_b3 + 8

    slab = jnp.zeros((R, C), dtype)
    slab = slab.at[r_w1:r_w1 + S, 0:H0].set(w1.astype(dtype))
    slab = slab.at[r_b1, 0:H0].set(b1.astype(dtype))
    slab = slab.at[r_w2:r_w2 + H0, 0:H1].set(w2.astype(dtype))
    slab = slab.at[r_b2, 0:H1].set(b2.astype(dtype))
    slab = slab.at[r_w3:r_w3 + H1, 0:A].set(w3.astype(dtype))
    slab = slab.at[r_b3, 0:A].set(b3.astype(dtype))

    meta = dict(S=S, A=A, H0p=H0p, H1p=H1p, Ap=Ap,
                r_w1=r_w1, r_b1=r_b1, r_w2=r_w2, r_b2=r_b2,
                r_w3=r_w3, r_b3=r_b3, R=R, C=C)
    return slab, meta


def critic_forward(x, slab, meta, *, batch_tile=256):
    """Critic MLP forward: x (batch, taille_state) -> (batch, taille_action)."""
    batch, S = x.shape
    assert S == meta["S"], "x feature dim does not match packed params"
    A, Ap = meta["A"], meta["Ap"]
    R, C = meta["R"], meta["C"]

    # Batch tile: large tile for big batches (amortizes per-step overhead,
    # comfortably within v7x's 64 MiB VMEM), small aligned tile otherwise.
    TB = batch_tile if batch >= batch_tile else _round_up(batch, 8)
    B_pad = _round_up(batch, TB)
    if B_pad != batch:
        x = jnp.pad(x, ((0, B_pad - batch), (0, 0)))

    kernel = functools.partial(_critic_kernel, m=meta)
    out = pl.pallas_call(
        kernel,
        out_shape=jax.ShapeDtypeStruct((B_pad, Ap), jnp.float32),
        grid_spec=pltpu.PrefetchScalarGridSpec(
            num_scalar_prefetch=0,
            grid=(B_pad // TB,),
            in_specs=[
                # x: batch-tiled, auto double-buffered across grid steps.
                pl.BlockSpec((TB, S), lambda i: (i, 0)),
                # param slab: same block every step -> stays VMEM-resident.
                pl.BlockSpec((R, C), lambda i: (0, 0)),
            ],
            # Lane-dense (TB, Ap) output tile.
            out_specs=pl.BlockSpec((TB, Ap), lambda i: (i, 0)),
        ),
        compiler_params=pltpu.CompilerParams(
            dimension_semantics=("parallel",)),
    )(x, slab)

    # Strip batch padding and the zero-padded action columns.
    return out[:batch, :A]


def init_critic_params(key, taille_state, taille_action, hidden):
    """Deterministic init mimicking torch.nn.Linear's U(-1/sqrt(in), 1/sqrt(in))."""
    k = jax.random.split(key, 6)
    dims = [(taille_state, hidden[0]), (hidden[0], hidden[1]),
            (hidden[1], taille_action)]
    params = {}
    for i, (fan_in, fan_out) in enumerate(dims, start=1):
        bound = 1.0 / jnp.sqrt(jnp.float32(fan_in))
        params[f"w{i}"] = jax.random.uniform(
            k[2 * (i - 1)], (fan_in, fan_out), jnp.float32, -bound, bound)
        params[f"b{i}"] = jax.random.uniform(
            k[2 * (i - 1) + 1], (1, fan_out), jnp.float32, -bound, bound)
    return params


def critic_reference(x, params):
    h1 = jnp.maximum(x @ params["w1"] + params["b1"], 0.0)
    h2 = jnp.maximum(h1 @ params["w2"] + params["b2"], 0.0)
    return h2 @ params["w3"] + params["b3"]


if __name__ == "__main__":
    # Small shapes consistent with the module's constructor signature.
    batch = 2
    taille_state = 16
    taille_action = 4
    hidden = [32, 32]

    key = jax.random.PRNGKey(0)
    k_params, k_x, k_x2 = jax.random.split(key, 3)
    params = init_critic_params(k_params, taille_state, taille_action, hidden)
    slab, meta = pack_params(params)  # pack_params(params, jnp.bfloat16) on v6e/v7x

    # Tiny-batch path (single grid step).
    x = jax.random.normal(k_x, (batch, taille_state), jnp.float32)
    out = jax.block_until_ready(critic_forward(x, slab, meta))
    ref = critic_reference(x, params)
    assert out.shape == (batch, taille_action)
    assert jnp.allclose(out, ref, atol=1e-5, rtol=1e-5), "mismatch vs JAX reference (small)"

    # Batch-grid path (multiple grid steps + batch padding).
    x_big = jax.random.normal(k_x2, (384, taille_state), jnp.float32)
    out_big = jax.block_until_ready(critic_forward(x_big, slab, meta))
    ref_big = critic_reference(x_big, params)
    assert out_big.shape == (384, taille_action)
    assert jnp.allclose(out_big, ref_big, atol=1e-4, rtol=1e-4), "mismatch vs JAX reference (grid)"

    print("KERNEL_OK")
</pallas_src>

<mosaic_0001>
module attributes {stable_mosaic.version = 11 : i64} {
  func.func @_critic_kernel(%arg0: i32, %arg1: memref<8x16xf32, #tpu.memory_space<vmem>>, %arg2: memref<296x128xf32, #tpu.memory_space<vmem>>, %arg3: memref<8x128xf32, #tpu.memory_space<vmem>>) attributes {dimension_semantics = [#tpu.dimension_semantics<parallel>], iteration_bounds = array<i64: 1>, scalar_prefetch = 0 : i64, scratch_operands = 0 : i64, tpu.core_type = #tpu.core_type<tc>, window_params = [{transform_indices = @transform_0, window_bounds = array<i64: 8, 16>}, {pipeline_mode = #tpu.pipeline_mode<synchronous>, transform_indices = @transform_1, window_bounds = array<i64: 296, 128>}, {transform_indices = @transform_2, window_bounds = array<i64: 8, 128>}]} {
    %c0 = arith.constant 0 : index
    %c0_0 = arith.constant 0 : index
    %0 = vector.load %arg1[%c0, %c0_0] : memref<8x16xf32, #tpu.memory_space<vmem>>, vector<8x16xf32>
    %c0_1 = arith.constant 0 : index
    %c0_2 = arith.constant 0 : index
    %1 = vector.load %arg2[%c0_1, %c0_2] : memref<296x128xf32, #tpu.memory_space<vmem>>, vector<16x128xf32>
    %c16 = arith.constant 16 : index
    %c0_3 = arith.constant 0 : index
    %2 = vector.load %arg2[%c16, %c0_3] : memref<296x128xf32, #tpu.memory_space<vmem>>, vector<1x128xf32>
    %cst = arith.constant dense<0.000000e+00> : vector<8x128xf32>
    %3 = tpu.matmul %0, %1, %cst {dimension_numbers = #tpu.dot_dimension_numbers<[1], [0], [0], [1], [0, 0, 1, 1], [], []>} : vector<8x16xf32>, vector<16x128xf32>, vector<8x128xf32> -> vector<8x128xf32>
    %4 = vector.broadcast %2 : vector<1x128xf32> to vector<8x128xf32>
    %5 = arith.addf %3, %4 : vector<8x128xf32>
    %cst_4 = arith.constant 0.000000e+00 : f32
    %6 = vector.broadcast %cst_4 : f32 to vector<8x128xf32>
    %7 = arith.maximumf %5, %6 : vector<8x128xf32>
    %c24 = arith.constant 24 : index
    %c0_5 = arith.constant 0 : index
    %8 = vector.load %arg2[%c24, %c0_5] : memref<296x128xf32, #tpu.memory_space<vmem>>, vector<128x128xf32>
    %c152 = arith.constant 152 : index
    %c0_6 = arith.constant 0 : index
    %9 = vector.load %arg2[%c152, %c0_6] : memref<296x128xf32, #tpu.memory_space<vmem>>, vector<1x128xf32>
    %cst_7 = arith.constant dense<0.000000e+00> : vector<8x128xf32>
    %10 = tpu.matmul %7, %8, %cst_7 {dimension_numbers = #tpu.dot_dimension_numbers<[1], [0], [0], [1], [0, 0, 1, 1], [], []>} : vector<8x128xf32>, vector<128x128xf32>, vector<8x128xf32> -> vector<8x128xf32>
    %11 = vector.broadcast %9 : vector<1x128xf32> to vector<8x128xf32>
    %12 = arith.addf %10, %11 : vector<8x128xf32>
    %cst_8 = arith.constant 0.000000e+00 : f32
    %13 = vector.broadcast %cst_8 : f32 to vector<8x128xf32>
    %14 = arith.maximumf %12, %13 : vector<8x128xf32>
    %c160 = arith.constant 160 : index
    %c0_9 = arith.constant 0 : index
    %15 = vector.load %arg2[%c160, %c0_9] : memref<296x128xf32, #tpu.memory_space<vmem>>, vector<128x128xf32>
    %c288 = arith.constant 288 : index
    %c0_10 = arith.constant 0 : index
    %16 = vector.load %arg2[%c288, %c0_10] : memref<296x128xf32, #tpu.memory_space<vmem>>, vector<1x128xf32>
    %cst_11 = arith.constant dense<0.000000e+00> : vector<8x128xf32>
    %17 = tpu.matmul %14, %15, %cst_11 {dimension_numbers = #tpu.dot_dimension_numbers<[1], [0], [0], [1], [0, 0, 1, 1], [], []>} : vector<8x128xf32>, vector<128x128xf32>, vector<8x128xf32> -> vector<8x128xf32>
    %18 = vector.broadcast %16 : vector<1x128xf32> to vector<8x128xf32>
    %19 = arith.addf %17, %18 : vector<8x128xf32>
    %c0_12 = arith.constant 0 : index
    %c0_13 = arith.constant 0 : index
    %20 = vector.load %arg3[%c0_12, %c0_13] : memref<8x128xf32, #tpu.memory_space<vmem>>, vector<8x128xf32>
    tpu.vector_store %arg3[%c0_12, %c0_13], %19 {strides = array<i32>} : memref<8x128xf32, #tpu.memory_space<vmem>>, vector<8x128xf32>,
    return
  }
  func.func @transform_0(%arg0: i32) -> (i32, i32) {
    %c0_i32 = arith.constant 0 : i32
    %c0_i32_0 = arith.constant 0 : i32
    return %arg0, %c0_i32 : i32, i32
  }
  func.func @transform_1(%arg0: i32) -> (i32, i32) {
    %c0_i32 = arith.constant 0 : i32
    %c0_i32_0 = arith.constant 0 : i32
    %c0_i32_1 = arith.constant 0 : i32
    return %c0_i32, %c0_i32_0 : i32, i32
  }
  func.func @transform_2(%arg0: i32) -> (i32, i32) {
    %c0_i32 = arith.constant 0 : i32
    %c0_i32_0 = arith.constant 0 : i32
    return %arg0, %c0_i32 : i32, i32
  }
}

</mosaic_0001>

<bundles_post_ra>
// kernel: tpu_custom_call.1
= control target key start
LH: loop header
LB: loop body
LE: loop exit
PB: predicated region body
PF: predicated region fallthrough
CT: control target
= control target key end

     0   :  { %7 = vsyncpa [#allocation3], 0  ;;  %s284_s0 = inlined_call_operand.hbm [shape: f32[8,16], index: 0, kind: input, shape index: {}]   ;;  %s285_s1 = inlined_call_operand.hbm [shape: f32[296,128], index: 1, kind: input, shape index: {}]   ;;  %s286_s2 = inlined_call_operand.hbm [shape: f32[8,128], index: 2, kind: output, shape index: {}]  }
   0x1   :  { %8 = vsyncpa [#allocation6], 0 }
   0x2   :  { %9 = vsyncpa [#allocation4], 0  ;;  %s15_s11 = sshll.u32 %s284_s0, 4  ;;  %s255_s12 = smov [#allocation2]   ;;  %s16_s11 = int_to_ptr.hbm [resolvable:$true] %s15_s11 }
   0x3   :  { %s17_s13 = sshll.u32 %s255_s12, 4  ;;  %s25_s16 = sshll.u32 %s285_s1, 4  ;;  %s18_s13 = int_to_ptr.vmem [resolvable:$true] %s17_s13  ;;  %s26_s16 = int_to_ptr.hbm [resolvable:$true] %s25_s16 }
   0x4   :  { %20 = dma.hbm_to_vmem [thread:$0]  %s16_s11, 128, %s18_s13, [#allocation3]  }
   0x5   :  { %s256_s17 = smov [#allocation5]   ;;  %s257_s19 = smov 128  }
   0x6   :  { %s27_s18 = sshll.u32 %s256_s17, 4  ;;  %s258_s20 = smov 8   ;;  %s28_s18 = int_to_ptr.vmem [resolvable:$true] %s27_s18 }
   0x7   :  { %33 = dma.hbm_to_vmem [thread:$0]  %s26_s16, 4736, %s28_s18, [#allocation6], %s257_s19, %s257_s19, %s258_s20  }
   0x8   :  { %249 = dma.done.wait [#allocation3], 128  }
   0x9   :  { %250 = vsyncadd [#allocation3], 4294967168 }
   0xa   :  { %251 = dma.done.wait [#allocation6], 4736  }
   0xb   :  { %252 = vsyncadd [#allocation6], 4294962560  ;;  %v44_v0 = vld [vmem:[#allocation5 + $0x8] sm:$0xff]  ;;  %v43_v1 = vld [vmem:[#allocation5] sm:$0xff]  ;;  %vm47_vm0 = vcmask 130048   ;;  %s259_s0 = smov [#allocation7]  }
   0xc   :  { %65 = vmatpush.msra.mxu0 %v44_v0  ;;  %v42_v2 = vld [vmem:[#allocation2] sm:$0xff]  ;;  %v87_v3 = vld [vmem:[#allocation5 + $0x90] sm:$0xff]  ;;  %v86_v4 = vld [vmem:[#allocation5 + $0x88] sm:$0xff]  ;;  %s155_s1 = sshll.u32 %s259_s0, 4  ;;  %s157_s23 = sshll.u32 %s286_s2, 4  ;;  %s156_s1 = int_to_ptr.vmem [resolvable:$true] %s155_s1  ;;  %s158_s23 = int_to_ptr.hbm [resolvable:$true] %s157_s23 }
   0xd   :  { %90 = vmatpush.msra.mxu1 %v87_v3  ;;  %v85_v5 = vld [vmem:[#allocation5 + $0x80] sm:$0xff]  ;;  %v84_v6 = vld [vmem:[#allocation5 + $0x78] sm:$0xff]  ;;  %v83_v7 = vld [vmem:[#allocation5 + $0x70] sm:$0xff] }
   0xe   :  { %66 = vmatpush.msra.mxu0 %v43_v1  ;;  %v82_v8 = vld [vmem:[#allocation5 + $0x68] sm:$0xff]  ;;  %v81_v9 = vld [vmem:[#allocation5 + $0x60] sm:$0xff]  ;;  %v80_v10 = vld [vmem:[#allocation5 + $0x58] sm:$0xff] }
   0xf   :  { %168 = vmatmul.msk.f32.vlgmr.msra.gmra.mxu0 %vm47_vm0, %v42_v2  ;;  %91 = vmatpush.msra.mxu1 %v86_v4  ;;  %v79_v11 = vld [vmem:[#allocation5 + $0x50] sm:$0xff]  ;;  %v78_v12 = vld [vmem:[#allocation5 + $0x48] sm:$0xff]  ;;  %v77_v13 = vld [vmem:[#allocation5 + $0x40] sm:$0xff] }
  0x10   :  { %v76_v14 = vld [vmem:[#allocation5 + $0x38] sm:$0xff]  ;;  %v75_v15 = vld [vmem:[#allocation5 + $0x30] sm:$0xff]  ;;  %v74_v16 = vld [vmem:[#allocation5 + $0x28] sm:$0xff] }
  0x11   :  { %92 = vmatpush.msra.mxu1 %v85_v5  ;;  %v73_v17 = vld [vmem:[#allocation5 + $0x20] sm:$0xff]  ;;  %v72_v18 = vld [vmem:[#allocation5 + $0x18] sm:$0xff]  ;;  %v125_v20 = vld [vmem:[#allocation5 + $0x110] sm:$0xff] }
  0x12   :  { %v126_v19 = vld [vmem:[#allocation5 + $0x118] sm:$0xff]  ;;  %v124_v21 = vld [vmem:[#allocation5 + $0x108] sm:$0xff]  ;;  %v123_v22 = vld [vmem:[#allocation5 + $0x100] sm:$0xff] }
  0x13   :  { %93 = vmatpush.msra.mxu1 %v84_v6  ;;  %129 = vmatpush.msra.mxu2 %v126_v19  ;;  %v122_v23 = vld [vmem:[#allocation5 + $0xf8] sm:$0xff]  ;;  %v121_v24 = vld [vmem:[#allocation5 + $0xf0] sm:$0xff]  ;;  %v120_v25 = vld [vmem:[#allocation5 + $0xe8] sm:$0xff] }
  0x14   :  { %v119_v26 = vld [vmem:[#allocation5 + $0xe0] sm:$0xff]  ;;  %v118_v27 = vld [vmem:[#allocation5 + $0xd8] sm:$0xff]  ;;  %v117_v28 = vld [vmem:[#allocation5 + $0xd0] sm:$0xff] }
  0x15   :  { %94 = vmatpush.msra.mxu1 %v83_v7  ;;  %130 = vmatpush.msra.mxu2 %v125_v20  ;;  %v116_v29 = vld [vmem:[#allocation5 + $0xc8] sm:$0xff]  ;;  %v115_v30 = vld [vmem:[#allocation5 + $0xc0] sm:$0xff]  ;;  %v114_v31 = vld [vmem:[#allocation5 + $0xb8] sm:$0xff] }
  0x16   :  { %v174_v32 = vld [vmem:[#allocation5 + $0x10] ss:$0 sm:$0xff]  ;;  %v112_v37 = vld [vmem:[#allocation5 + $0xa8] sm:$0xff]  ;;  %v111_v38 = vld [vmem:[#allocation5 + $0xa0] sm:$0xff] }
  0x17   :  { %95 = vmatpush.msra.mxu1 %v82_v8  ;;  %131 = vmatpush.msra.mxu2 %v124_v21  ;;  %v113_v36 = vld [vmem:[#allocation5 + $0xb0] sm:$0xff]  ;;  %v175_v39 = vld [vmem:[#allocation5 + $0x98] ss:$0 sm:$0xff]  ;;  %v176_v43 = vld [vmem:[#allocation5 + $0x120] ss:$0 sm:$0xff] }
  0x19   :  { %96 = vmatpush.msra.mxu1 %v81_v9  ;;  %132 = vmatpush.msra.mxu2 %v123_v22 }
  0x1b   :  { %97 = vmatpush.msra.mxu1 %v80_v10  ;;  %133 = vmatpush.msra.mxu2 %v122_v23 }
  0x1d   :  { %98 = vmatpush.msra.mxu1 %v79_v11  ;;  %134 = vmatpush.msra.mxu2 %v121_v24 }
  0x1f   :  { %99 = vmatpush.msra.mxu1 %v78_v12  ;;  %135 = vmatpush.msra.mxu2 %v120_v25 }
  0x21   :  { %100 = vmatpush.msra.mxu1 %v77_v13  ;;  %136 = vmatpush.msra.mxu2 %v119_v26 }
  0x23   :  { %101 = vmatpush.msra.mxu1 %v76_v14  ;;  %137 = vmatpush.msra.mxu2 %v118_v27 }
  0x25   :  { %102 = vmatpush.msra.mxu1 %v75_v15  ;;  %138 = vmatpush.msra.mxu2 %v117_v28 }
  0x27   :  { %103 = vmatpush.msra.mxu1 %v74_v16  ;;  %139 = vmatpush.msra.mxu2 %v116_v29 }
  0x29   :  { %104 = vmatpush.msra.mxu1 %v73_v17  ;;  %140 = vmatpush.msra.mxu2 %v115_v30 }
  0x2b   :  { %105 = vmatpush.msra.mxu1 %v72_v18  ;;  %141 = vmatpush.msra.mxu2 %v114_v31 }
  0x2d   :  { %142 = vmatpush.msra.mxu2 %v113_v36 }
  0x2f   :  { %143 = vmatpush.msra.mxu2 %v112_v37 }
  0x31   :  { %144 = vmatpush.msra.mxu2 %v111_v38 }
  0x8c   :  { %v68_v33 = vpop.f32.mrf.mxu0 }
  0x8d   :  { %v69_v34 = vadd.f32 %v174_v32, %v68_v33 }
  0x8f   :  { %v71_v35 = vmax.f32 %v69_v34, 0.0 }
  0x91   :  { %106 = vmatmul.f32.vlgmr.msra.gmra.mxu1 %v71_v35 }
 0x10e   :  { %v107_v40 = vpop.f32.mrf.mxu1 }
 0x10f   :  { %v108_v41 = vadd.f32 %v175_v39, %v107_v40 }
 0x111   :  { %v110_v42 = vmax.f32 %v108_v41, 0.0 }
 0x113   :  { %145 = vmatmul.f32.vlgmr.msra.gmra.mxu2 %v110_v42 }
 0x196   :  { %v146_v44 = vpop.f32.mrf.mxu2 }
 0x197   :  { %v147_v45 = vadd.f32 %v176_v43, %v146_v44 }
 0x199   :  { %149 = vst [vmem:[#allocation7] sm:$0xff] %v147_v45 }
 0x19a   :  { %160 = dma.vmem_to_hbm [thread:$0]  %s156_s1, 128, %s158_s23, [#allocation4]  }
 0x19b   :  { %253 = dma.done.wait [#allocation4], 128  }
 0x19c   :  { %254 = vsyncadd [#allocation4], 4294967168 }
 0x19d   :  { %165 = vsyncpa [#allocation3], 1 }
 0x19e   :  { %166 = vsyncpa [#allocation6], 1 }
 0x19f   :  { %167 = vsyncpa [#allocation4], 1 }

</bundles_post_ra>
